<compile_context>
chip_gen: v7x
topology: tpu7x:2x2x1
jax: 0.10.0
libtpu: 0.0.40
codegen_flags: <defaults>
</compile_context>

<pallas_src>
import functools

import jax
import jax.numpy as jnp
from jax.experimental import pallas as pl
from jax.experimental.pallas import tpu as pltpu

LN_EPS = 1e-5  # PyTorch LayerNorm default eps


def _round_up(x, m):
    return ((x + m - 1) // m) * m


def _vmem_capacity_bytes():
    """Per-core VMEM capacity; conservative fallback if the query is unavailable."""
    try:
        return int(pltpu.get_tpu_info().vmem_capacity_bytes)
    except Exception:
        return 64 * 2**20  # v7x per-core VMEM (smallest of v5e/v6e/v7x)


# ---------------------------------------------------------------------------
# Fused encoder kernel: all LinearReLU layers + fused (mu|logvar) head
# ---------------------------------------------------------------------------
def _fused_encoder_kernel(n_ln, x_ref, *refs):
    """refs = (w0, b0, w1, b1, ..., w_{n_ln-1}, b_{n_ln-1}, w_heads, b_heads, out_ref)."""
    out_ref = refs[-1]
    wb = refs[:-1]

    h = x_ref[...]
    for li in range(n_ln):                       # unrolled at trace time
        w = wb[2 * li][...]
        b = wb[2 * li + 1][...]                  # f32 (1, H)
        y = jnp.dot(h, w, preferred_element_type=jnp.float32) + b
        mean = jnp.mean(y, axis=-1, keepdims=True)
        centered = y - mean
        var = jnp.mean(centered * centered, axis=-1, keepdims=True)
        h_f32 = jnp.maximum(centered * jax.lax.rsqrt(var + LN_EPS), 0.0)
        h = h_f32.astype(w.dtype)                # back to compute dtype for next matmul

    w_heads = wb[2 * n_ln][...]
    b_heads = wb[2 * n_ln + 1][...]
    out_ref[...] = (jnp.dot(h, w_heads, preferred_element_type=jnp.float32)
                    + b_heads).astype(out_ref.dtype)


def encoder_forward(params, x, *, tb=512):
    """Fused Encoder forward.  Returns (mu, logvar), each [B, z_dim] in float32.

    Compute dtype is inferred from the weight dtype in `params` (use
    cast_encoder_params(params, jnp.bfloat16) once for the bf16 MXU fast path).
    """
    w0, b0 = params["x2h"]
    seq = params["seq"]
    w_mu, b_mu = params["h2mu"]
    w_lv, b_lv = params["h2logvar"]

    B, Dx = x.shape
    H = w0.shape[1]
    Z = w_mu.shape[1]
    n_seq = len(seq)
    n_ln = 1 + n_seq                              # total LinearReLU (LayerNorm) blocks

    compute_dtype = w0.dtype
    out_dtype = jnp.float32
    if x.dtype != compute_dtype:
        x = x.astype(compute_dtype)

    # Fuse the two heads into a single N = 2*Z matmul; pad N to a lane-dense width.
    w_heads = jnp.concatenate([w_mu, w_lv], axis=1).astype(compute_dtype)   # [H, 2Z]
    b_heads = jnp.concatenate([b_mu, b_lv], axis=0).astype(jnp.float32)     # [2Z]
    Wp = _round_up(2 * Z, 128)
    if Wp != 2 * Z:
        w_heads = jnp.pad(w_heads, ((0, 0), (0, Wp - 2 * Z)))
        b_heads = jnp.pad(b_heads, (0, Wp - 2 * Z))

    x_bytes = jnp.dtype(compute_dtype).itemsize
    w_bytes = x_bytes
    o_bytes = jnp.dtype(out_dtype).itemsize
    sublane = 16 if x_bytes == 2 else 8

    # ----- generation-aware VMEM budget (128 MiB v5e/v6e, 64 MiB v7x) -----
    vmem_cap = _vmem_capacity_bytes()
    tile_budget = int(vmem_cap * 0.55)
    vmem_limit = int(vmem_cap * 0.75)

    # Resident weights/biases (count 2x for buffering conservatism).
    weights_bytes = 2 * ((Dx * H + n_seq * H * H + H * Wp) * w_bytes
                         + (n_ln * H + Wp) * 4)

    def tile_bytes(tb_):
        return (2 * tb_ * Dx * x_bytes            # x tiles (double-buffered)
                + weights_bytes                   # resident weights + biases
                + 2 * tb_ * Wp * o_bytes          # output tiles (double-buffered)
                + 10 * tb_ * max(H, Wp, 128) * 4) # activation temporaries slack

    tb = max(sublane, (min(_round_up(B, sublane), _round_up(tb, sublane))
                       // sublane) * sublane)
    while tile_bytes(tb) > tile_budget and tb > sublane:
        tb = max(sublane, (tb // 2 // sublane) * sublane)
    if tile_bytes(tb) > tile_budget:
        # TODO(synk): K-tile the x->h layer (instead of keeping every weight resident)
        # for extremely large x_dim that does not fit the VMEM budget.
        raise ValueError("Encoder weights too large for the fused Pallas kernel")

    # Keep >= 2 batch tiles so the 'parallel' axis can shard across both TensorCores
    # on v7x (negligible per-step cost on single-TC v5e/v6e).
    if B >= 2 * sublane:
        tb = min(tb, _round_up(pl.cdiv(B, 2), sublane))

    Bp = _round_up(B, tb)
    if Bp != B:
        x = jnp.pad(x, ((0, Bp - B), (0, 0)))     # single pad of the input only
    nb = Bp // tb

    # ----- operands + BlockSpecs (weights use constant index maps -> resident) -----
    operands = [x]
    in_specs = [pl.BlockSpec((tb, Dx), lambda i: (i, 0))]
    for (w, b) in [(w0, b0)] + list(seq):
        w = w.astype(compute_dtype)
        b2d = b.reshape(1, H).astype(jnp.float32)
        operands += [w, b2d]
        in_specs += [pl.BlockSpec(tuple(w.shape), lambda i: (0, 0)),
                     pl.BlockSpec((1, H), lambda i: (0, 0))]
    operands += [w_heads, b_heads.reshape(1, Wp)]
    in_specs += [pl.BlockSpec((H, Wp), lambda i: (0, 0)),
                 pl.BlockSpec((1, Wp), lambda i: (0, 0))]

    cost = pl.CostEstimate(
        flops=2 * Bp * (Dx * H + n_seq * H * H + H * Wp) + 7 * Bp * H * n_ln,
        transcendentals=Bp * n_ln,
        bytes_accessed=(Bp * Dx * x_bytes
                        + (Dx * H + n_seq * H * H + H * Wp) * w_bytes
                        + (n_ln * H + Wp) * 4
                        + Bp * Wp * o_bytes),
    )

    out = pl.pallas_call(
        functools.partial(_fused_encoder_kernel, n_ln),
        out_shape=jax.ShapeDtypeStruct((Bp, Wp), out_dtype),
        grid_spec=pltpu.PrefetchScalarGridSpec(
            num_scalar_prefetch=0,
            grid=(nb,),
            in_specs=in_specs,
            out_specs=pl.BlockSpec((tb, Wp), lambda i: (i, 0)),
        ),
        compiler_params=pltpu.CompilerParams(
            dimension_semantics=("parallel",),
            vmem_limit_bytes=vmem_limit,
        ),
        cost_estimate=cost,
    )(*operands)

    mu = out[:B, :Z]
    logvar = out[:B, Z:2 * Z]
    return mu, logvar


# ---------------------------------------------------------------------------
# Parameter helpers
# ---------------------------------------------------------------------------
def init_encoder_params(key, num_h_layers, x_dim, h_dim, z_dim, dtype=jnp.float32):
    """Mimics nn.Linear default init: U(-1/sqrt(fan_in), 1/sqrt(fan_in)) for W and b."""
    def linear_init(k, fan_in, fan_out):
        kw, kb = jax.random.split(k)
        bound = 1.0 / jnp.sqrt(jnp.asarray(fan_in, jnp.float32))
        w = jax.random.uniform(kw, (fan_in, fan_out), dtype, -bound, bound)
        b = jax.random.uniform(kb, (fan_out,), dtype, -bound, bound)
        return w, b

    n_seq = num_h_layers - 1
    keys = jax.random.split(key, n_seq + 3)
    return {
        "x2h": linear_init(keys[0], x_dim, h_dim),
        "seq": [linear_init(keys[1 + i], h_dim, h_dim) for i in range(n_seq)],
        "h2mu": linear_init(keys[n_seq + 1], h_dim, z_dim),
        "h2logvar": linear_init(keys[n_seq + 2], h_dim, z_dim),
    }


def cast_encoder_params(params, dtype):
    """Pre-cast weights once (e.g. to bf16 for the MXU path); biases stay f32."""
    def cast_pair(p):
        w, b = p
        return (w.astype(dtype), b)
    return {
        "x2h": cast_pair(params["x2h"]),
        "seq": [cast_pair(p) for p in params["seq"]],
        "h2mu": cast_pair(params["h2mu"]),
        "h2logvar": cast_pair(params["h2logvar"]),
    }


# ---------------------------------------------------------------------------
# Pure-JAX reference
# ---------------------------------------------------------------------------
def _ref_linear_ln_relu(x, w, b):
    y = x @ w + b
    m = jnp.mean(y, axis=-1, keepdims=True)
    v = jnp.mean((y - m) ** 2, axis=-1, keepdims=True)
    return jnp.maximum((y - m) / jnp.sqrt(v + LN_EPS), 0.0)


def _ref_encoder(params, x):
    h = _ref_linear_ln_relu(x, *params["x2h"])
    for w, b in params["seq"]:
        h = _ref_linear_ln_relu(h, w, b)
    mu = h @ params["h2mu"][0] + params["h2mu"][1]
    lv = h @ params["h2logvar"][0] + params["h2logvar"][1]
    return mu, lv


if __name__ == "__main__":
    key = jax.random.PRNGKey(0)
    k_p, k_x = jax.random.split(key)

    # Small Encoder config: Encoder(num_h_layers=3, x_dim=32, h_dim=128, z_dim=16)
    num_h_layers, x_dim, h_dim, z_dim = 3, 32, 128, 16
    batch = 16

    params = init_encoder_params(k_p, num_h_layers, x_dim, h_dim, z_dim)
    x = jax.random.normal(k_x, (batch, x_dim), jnp.float32)

    # f32 path + reference check
    mu, logvar = encoder_forward(params, x)
    mu, logvar = jax.block_until_ready((mu, logvar))
    mu_ref, lv_ref = _ref_encoder(params, x)
    assert mu.shape == (batch, z_dim) and logvar.shape == (batch, z_dim)
    assert jnp.allclose(mu, mu_ref, atol=1e-4, rtol=1e-4), "mu mismatch vs reference"
    assert jnp.allclose(logvar, lv_ref, atol=1e-4, rtol=1e-4), "logvar mismatch vs reference"

    # bf16 MXU path: weights pre-cast ONCE; accumulation/LayerNorm stay f32.
    params_bf16 = cast_encoder_params(params, jnp.bfloat16)
    mu_b, lv_b = encoder_forward(params_bf16, x)
    mu_b, lv_b = jax.block_until_ready((mu_b, lv_b))
    assert bool(jnp.isfinite(mu_b).all()) and bool(jnp.isfinite(lv_b).all())
    rel_mu = float(jnp.linalg.norm(mu_b - mu_ref) / (jnp.linalg.norm(mu_ref) + 1e-6))
    rel_lv = float(jnp.linalg.norm(lv_b - lv_ref) / (jnp.linalg.norm(lv_ref) + 1e-6))
    assert rel_mu < 0.1 and rel_lv < 0.1, (rel_mu, rel_lv)

    print("KERNEL_OK")
</pallas_src>

<mosaic_0001>
module attributes {stable_mosaic.version = 11 : i64} {
  func.func @_fused_encoder_kernel(%arg0: i32, %arg1: memref<8x32xf32, #tpu.memory_space<vmem>>, %arg2: memref<32x128xf32, #tpu.memory_space<vmem>>, %arg3: memref<1x128xf32, #tpu.memory_space<vmem>>, %arg4: memref<128x128xf32, #tpu.memory_space<vmem>>, %arg5: memref<1x128xf32, #tpu.memory_space<vmem>>, %arg6: memref<128x128xf32, #tpu.memory_space<vmem>>, %arg7: memref<1x128xf32, #tpu.memory_space<vmem>>, %arg8: memref<128x128xf32, #tpu.memory_space<vmem>>, %arg9: memref<1x128xf32, #tpu.memory_space<vmem>>, %arg10: memref<8x128xf32, #tpu.memory_space<vmem>>) attributes {dimension_semantics = [#tpu.dimension_semantics<parallel>], iteration_bounds = array<i64: 2>, scalar_prefetch = 0 : i64, scratch_operands = 0 : i64, tpu.core_type = #tpu.core_type<tc>, window_params = [{transform_indices = @transform_0, window_bounds = array<i64: 8, 32>}, {pipeline_mode = #tpu.pipeline_mode<synchronous>, transform_indices = @transform_1, window_bounds = array<i64: 32, 128>}, {pipeline_mode = #tpu.pipeline_mode<synchronous>, transform_indices = @transform_2, window_bounds = array<i64: 1, 128>}, {pipeline_mode = #tpu.pipeline_mode<synchronous>, transform_indices = @transform_3, window_bounds = array<i64: 128, 128>}, {pipeline_mode = #tpu.pipeline_mode<synchronous>, transform_indices = @transform_4, window_bounds = array<i64: 1, 128>}, {pipeline_mode = #tpu.pipeline_mode<synchronous>, transform_indices = @transform_5, window_bounds = array<i64: 128, 128>}, {pipeline_mode = #tpu.pipeline_mode<synchronous>, transform_indices = @transform_6, window_bounds = array<i64: 1, 128>}, {pipeline_mode = #tpu.pipeline_mode<synchronous>, transform_indices = @transform_7, window_bounds = array<i64: 128, 128>}, {pipeline_mode = #tpu.pipeline_mode<synchronous>, transform_indices = @transform_8, window_bounds = array<i64: 1, 128>}, {transform_indices = @transform_9, window_bounds = array<i64: 8, 128>}]} {
    %c0 = arith.constant 0 : index
    %c0_0 = arith.constant 0 : index
    %0 = vector.load %arg1[%c0, %c0_0] : memref<8x32xf32, #tpu.memory_space<vmem>>, vector<8x32xf32>
    %c0_1 = arith.constant 0 : index
    %c0_2 = arith.constant 0 : index
    %1 = vector.load %arg2[%c0_1, %c0_2] : memref<32x128xf32, #tpu.memory_space<vmem>>, vector<32x128xf32>
    %c0_3 = arith.constant 0 : index
    %c0_4 = arith.constant 0 : index
    %2 = vector.load %arg3[%c0_3, %c0_4] : memref<1x128xf32, #tpu.memory_space<vmem>>, vector<1x128xf32>
    %cst = arith.constant dense<0.000000e+00> : vector<8x128xf32>
    %3 = tpu.matmul %0, %1, %cst {dimension_numbers = #tpu.dot_dimension_numbers<[1], [0], [0], [1], [0, 0, 1, 1], [], []>} : vector<8x32xf32>, vector<32x128xf32>, vector<8x128xf32> -> vector<8x128xf32>
    %4 = vector.broadcast %2 : vector<1x128xf32> to vector<8x128xf32>
    %5 = arith.addf %3, %4 : vector<8x128xf32>
    %cst_5 = arith.constant dense<0.000000e+00> : vector<8xf32>
    %6 = vector.multi_reduction <add>, %5, %cst_5 [1] : vector<8x128xf32> to vector<8xf32>
    %7 = vector.shape_cast %6 : vector<8xf32> to vector<8x1xf32>
    %cst_6 = arith.constant 1.280000e+02 : f32
    %8 = vector.broadcast %cst_6 : f32 to vector<8x1xf32>
    %9 = arith.divf %7, %8 : vector<8x1xf32>
    %10 = vector.broadcast %9 : vector<8x1xf32> to vector<8x128xf32>
    %11 = arith.subf %5, %10 : vector<8x128xf32>
    %12 = arith.mulf %11, %11 : vector<8x128xf32>
    %cst_7 = arith.constant dense<0.000000e+00> : vector<8xf32>
    %13 = vector.multi_reduction <add>, %12, %cst_7 [1] : vector<8x128xf32> to vector<8xf32>
    %14 = vector.shape_cast %13 : vector<8xf32> to vector<8x1xf32>
    %cst_8 = arith.constant 1.280000e+02 : f32
    %15 = vector.broadcast %cst_8 : f32 to vector<8x1xf32>
    %16 = arith.divf %14, %15 : vector<8x1xf32>
    %cst_9 = arith.constant 9.99999974E-6 : f32
    %17 = vector.broadcast %cst_9 : f32 to vector<8x1xf32>
    %18 = arith.addf %16, %17 : vector<8x1xf32>
    %19 = math.rsqrt %18 : vector<8x1xf32>
    %20 = vector.broadcast %19 : vector<8x1xf32> to vector<8x128xf32>
    %21 = arith.mulf %11, %20 : vector<8x128xf32>
    %cst_10 = arith.constant 0.000000e+00 : f32
    %22 = vector.broadcast %cst_10 : f32 to vector<8x128xf32>
    %23 = arith.maximumf %21, %22 : vector<8x128xf32>
    %c0_11 = arith.constant 0 : index
    %c0_12 = arith.constant 0 : index
    %24 = vector.load %arg4[%c0_11, %c0_12] : memref<128x128xf32, #tpu.memory_space<vmem>>, vector<128x128xf32>
    %c0_13 = arith.constant 0 : index
    %c0_14 = arith.constant 0 : index
    %25 = vector.load %arg5[%c0_13, %c0_14] : memref<1x128xf32, #tpu.memory_space<vmem>>, vector<1x128xf32>
    %cst_15 = arith.constant dense<0.000000e+00> : vector<8x128xf32>
    %26 = tpu.matmul %23, %24, %cst_15 {dimension_numbers = #tpu.dot_dimension_numbers<[1], [0], [0], [1], [0, 0, 1, 1], [], []>} : vector<8x128xf32>, vector<128x128xf32>, vector<8x128xf32> -> vector<8x128xf32>
    %27 = vector.broadcast %25 : vector<1x128xf32> to vector<8x128xf32>
    %28 = arith.addf %26, %27 : vector<8x128xf32>
    %cst_16 = arith.constant dense<0.000000e+00> : vector<8xf32>
    %29 = vector.multi_reduction <add>, %28, %cst_16 [1] : vector<8x128xf32> to vector<8xf32>
    %30 = vector.shape_cast %29 : vector<8xf32> to vector<8x1xf32>
    %cst_17 = arith.constant 1.280000e+02 : f32
    %31 = vector.broadcast %cst_17 : f32 to vector<8x1xf32>
    %32 = arith.divf %30, %31 : vector<8x1xf32>
    %33 = vector.broadcast %32 : vector<8x1xf32> to vector<8x128xf32>
    %34 = arith.subf %28, %33 : vector<8x128xf32>
    %35 = arith.mulf %34, %34 : vector<8x128xf32>
    %cst_18 = arith.constant dense<0.000000e+00> : vector<8xf32>
    %36 = vector.multi_reduction <add>, %35, %cst_18 [1] : vector<8x128xf32> to vector<8xf32>
    %37 = vector.shape_cast %36 : vector<8xf32> to vector<8x1xf32>
    %cst_19 = arith.constant 1.280000e+02 : f32
    %38 = vector.broadcast %cst_19 : f32 to vector<8x1xf32>
    %39 = arith.divf %37, %38 : vector<8x1xf32>
    %cst_20 = arith.constant 9.99999974E-6 : f32
    %40 = vector.broadcast %cst_20 : f32 to vector<8x1xf32>
    %41 = arith.addf %39, %40 : vector<8x1xf32>
    %42 = math.rsqrt %41 : vector<8x1xf32>
    %43 = vector.broadcast %42 : vector<8x1xf32> to vector<8x128xf32>
    %44 = arith.mulf %34, %43 : vector<8x128xf32>
    %cst_21 = arith.constant 0.000000e+00 : f32
    %45 = vector.broadcast %cst_21 : f32 to vector<8x128xf32>
    %46 = arith.maximumf %44, %45 : vector<8x128xf32>
    %c0_22 = arith.constant 0 : index
    %c0_23 = arith.constant 0 : index
    %47 = vector.load %arg6[%c0_22, %c0_23] : memref<128x128xf32, #tpu.memory_space<vmem>>, vector<128x128xf32>
    %c0_24 = arith.constant 0 : index
    %c0_25 = arith.constant 0 : index
    %48 = vector.load %arg7[%c0_24, %c0_25] : memref<1x128xf32, #tpu.memory_space<vmem>>, vector<1x128xf32>
    %cst_26 = arith.constant dense<0.000000e+00> : vector<8x128xf32>
    %49 = tpu.matmul %46, %47, %cst_26 {dimension_numbers = #tpu.dot_dimension_numbers<[1], [0], [0], [1], [0, 0, 1, 1], [], []>} : vector<8x128xf32>, vector<128x128xf32>, vector<8x128xf32> -> vector<8x128xf32>
    %50 = vector.broadcast %48 : vector<1x128xf32> to vector<8x128xf32>
    %51 = arith.addf %49, %50 : vector<8x128xf32>
    %cst_27 = arith.constant dense<0.000000e+00> : vector<8xf32>
    %52 = vector.multi_reduction <add>, %51, %cst_27 [1] : vector<8x128xf32> to vector<8xf32>
    %53 = vector.shape_cast %52 : vector<8xf32> to vector<8x1xf32>
    %cst_28 = arith.constant 1.280000e+02 : f32
    %54 = vector.broadcast %cst_28 : f32 to vector<8x1xf32>
    %55 = arith.divf %53, %54 : vector<8x1xf32>
    %56 = vector.broadcast %55 : vector<8x1xf32> to vector<8x128xf32>
    %57 = arith.subf %51, %56 : vector<8x128xf32>
    %58 = arith.mulf %57, %57 : vector<8x128xf32>
    %cst_29 = arith.constant dense<0.000000e+00> : vector<8xf32>
    %59 = vector.multi_reduction <add>, %58, %cst_29 [1] : vector<8x128xf32> to vector<8xf32>
    %60 = vector.shape_cast %59 : vector<8xf32> to vector<8x1xf32>
    %cst_30 = arith.constant 1.280000e+02 : f32
    %61 = vector.broadcast %cst_30 : f32 to vector<8x1xf32>
    %62 = arith.divf %60, %61 : vector<8x1xf32>
    %cst_31 = arith.constant 9.99999974E-6 : f32
    %63 = vector.broadcast %cst_31 : f32 to vector<8x1xf32>
    %64 = arith.addf %62, %63 : vector<8x1xf32>
    %65 = math.rsqrt %64 : vector<8x1xf32>
    %66 = vector.broadcast %65 : vector<8x1xf32> to vector<8x128xf32>
    %67 = arith.mulf %57, %66 : vector<8x128xf32>
    %cst_32 = arith.constant 0.000000e+00 : f32
    %68 = vector.broadcast %cst_32 : f32 to vector<8x128xf32>
    %69 = arith.maximumf %67, %68 : vector<8x128xf32>
    %c0_33 = arith.constant 0 : index
    %c0_34 = arith.constant 0 : index
    %70 = vector.load %arg8[%c0_33, %c0_34] : memref<128x128xf32, #tpu.memory_space<vmem>>, vector<128x128xf32>
    %c0_35 = arith.constant 0 : index
    %c0_36 = arith.constant 0 : index
    %71 = vector.load %arg9[%c0_35, %c0_36] : memref<1x128xf32, #tpu.memory_space<vmem>>, vector<1x128xf32>
    %cst_37 = arith.constant dense<0.000000e+00> : vector<8x128xf32>
    %72 = tpu.matmul %69, %70, %cst_37 {dimension_numbers = #tpu.dot_dimension_numbers<[1], [0], [0], [1], [0, 0, 1, 1], [], []>} : vector<8x128xf32>, vector<128x128xf32>, vector<8x128xf32> -> vector<8x128xf32>
    %73 = vector.broadcast %71 : vector<1x128xf32> to vector<8x128xf32>
    %74 = arith.addf %72, %73 : vector<8x128xf32>
    %c0_38 = arith.constant 0 : index
    %c0_39 = arith.constant 0 : index
    %75 = vector.load %arg10[%c0_38, %c0_39] : memref<8x128xf32, #tpu.memory_space<vmem>>, vector<8x128xf32>
    tpu.vector_store %arg10[%c0_38, %c0_39], %74 {strides = array<i32>} : memref<8x128xf32, #tpu.memory_space<vmem>>, vector<8x128xf32>,
    return
  }
  func.func @transform_0(%arg0: i32) -> (i32, i32) {
    %c0_i32 = arith.constant 0 : i32
    %c0_i32_0 = arith.constant 0 : i32
    return %arg0, %c0_i32 : i32, i32
  }
  func.func @transform_1(%arg0: i32) -> (i32, i32) {
    %c0_i32 = arith.constant 0 : i32
    %c0_i32_0 = arith.constant 0 : i32
    %c0_i32_1 = arith.constant 0 : i32
    return %c0_i32, %c0_i32_0 : i32, i32
  }
  func.func @transform_2(%arg0: i32) -> (i32, i32) {
    %c0_i32 = arith.constant 0 : i32
    %c0_i32_0 = arith.constant 0 : i32
    %c0_i32_1 = arith.constant 0 : i32
    return %c0_i32, %c0_i32_0 : i32, i32
  }
  func.func @transform_3(%arg0: i32) -> (i32, i32) {
    %c0_i32 = arith.constant 0 : i32
    %c0_i32_0 = arith.constant 0 : i32
    %c0_i32_1 = arith.constant 0 : i32
    return %c0_i32, %c0_i32_0 : i32, i32
  }
  func.func @transform_4(%arg0: i32) -> (i32, i32) {
    %c0_i32 = arith.constant 0 : i32
    %c0_i32_0 = arith.constant 0 : i32
    %c0_i32_1 = arith.constant 0 : i32
    return %c0_i32, %c0_i32_0 : i32, i32
  }
  func.func @transform_5(%arg0: i32) -> (i32, i32) {
    %c0_i32 = arith.constant 0 : i32
    %c0_i32_0 = arith.constant 0 : i32
    %c0_i32_1 = arith.constant 0 : i32
    return %c0_i32, %c0_i32_0 : i32, i32
  }
  func.func @transform_6(%arg0: i32) -> (i32, i32) {
    %c0_i32 = arith.constant 0 : i32
    %c0_i32_0 = arith.constant 0 : i32
    %c0_i32_1 = arith.constant 0 : i32
    return %c0_i32, %c0_i32_0 : i32, i32
  }
  func.func @transform_7(%arg0: i32) -> (i32, i32) {
    %c0_i32 = arith.constant 0 : i32
    %c0_i32_0 = arith.constant 0 : i32
    %c0_i32_1 = arith.constant 0 : i32
    return %c0_i32, %c0_i32_0 : i32, i32
  }
  func.func @transform_8(%arg0: i32) -> (i32, i32) {
    %c0_i32 = arith.constant 0 : i32
    %c0_i32_0 = arith.constant 0 : i32
    %c0_i32_1 = arith.constant 0 : i32
    return %c0_i32, %c0_i32_0 : i32, i32
  }
  func.func @transform_9(%arg0: i32) -> (i32, i32) {
    %c0_i32 = arith.constant 0 : i32
    %c0_i32_0 = arith.constant 0 : i32
    return %arg0, %c0_i32 : i32, i32
  }
}

</mosaic_0001>

<bundles_post_ra>
// kernel: tpu_custom_call.1
= control target key start
LH: loop header
LB: loop body
LE: loop exit
PB: predicated region body
PF: predicated region fallthrough
CT: control target
= control target key end

     0   :  { %s1925_s0 = inlined_call_operand.hbm [shape: f32[16,32], index: 0, kind: input, shape index: {}]   ;;  %s1926_s1 = inlined_call_operand.hbm [shape: f32[32,128], index: 1, kind: input, shape index: {}]   ;;  %s1927_s2 = inlined_call_operand.vmem [shape: f32[1,128], index: 2, kind: input, shape index: {}]   ;;  %s1928_s3 = inlined_call_operand.hbm [shape: f32[128,128], index: 3, kind: input, shape index: {}]   ;;  %s1929_s4 = inlined_call_operand.vmem [shape: f32[1,128], index: 4, kind: input, shape index: {}]   ;;  %s1930_s5 = inlined_call_operand.hbm [shape: f32[128,128], index: 5, kind: input, shape index: {}]   ;;  %s1931_s6 = inlined_call_operand.vmem [shape: f32[1,128], index: 6, kind: input, shape index: {}]   ;;  %s1932_s7 = inlined_call_operand.hbm [shape: f32[128,128], index: 7, kind: input, shape index: {}]   ;;  %s1933_s8 = inlined_call_operand.vmem [shape: f32[1,128], index: 8, kind: input, shape index: {}]   ;;  %s1934_s9 = inlined_call_operand.hbm [shape: f32[16,128], index: 9, kind: output, shape index: {}]  }
   0x1   :  { %1939 = sst [smem:[#allocation16_spill]] %s1926_s1 }
   0x2   :  { %1940 = sst [smem:[#allocation17_spill]] %s1934_s9 }
   0x3   :  { %14 = vsyncpa [#allocation3], 0 }
   0x4   :  { %16 = vsyncpa [#allocation3 + $0x1], 0 }
   0x5   :  { %17 = vsyncpa [#allocation6], 0 }
   0x6   :  { %18 = vsyncpa [#allocation9], 0 }
   0x7   :  { %19 = vsyncpa [#allocation4], 0 }
   0x8   :  { %21 = vsyncpa [#allocation4 + $0x1], 0  ;;  %s1583_s30 = smov 0   ;;  %s1585_s10 = smov 0  }
   0x9   :  { %s1587_s11 = smov 0   ;;  %s1589_s12 = smov 0  }
   0xa LB: > { %s1522_s13 = smov [#allocation5]   ;;  %s1604_s15 = sadd.s32 4294967295, %s1520_s12   ;;  %s1520_s12 = sphi %s1589_s12, %s1963_s12   ;;  %s1516_s11 = sphi %s1587_s11, %s1962_s11   ;;  %s1512_s10 = sphi %s1585_s10, %s1961_s10   ;;  %s1508_s30 = sphi %s1583_s30, %s1960_s30  }
   0xb   : > { %s264_s14 = sshll.u32 %s1522_s13, 4  ;;  %p932_p0 = scmp.ge.s32.totalorder %s1520_s12, 1  ;;  %s1609_s14 = int_to_ptr.vmem [resolvable:$true] %s264_s14 }
   0xc   : > { %p1936_p1 = scmp.eq.s32.totalorder %s1604_s15, 0  ;;  %p252_p2 = scmp.lt.s32.totalorder %s1520_s12, 3 }
   0xd   : > { %s1523_s17 = smov [#allocation8]   ;;  %s1524_s20 = smov [#allocation7]  }
   0xe   : > { %p1611_p3 = pnand %p932_p0, %p252_p2  ;;  %s296_s18 = sshll.u32 %s1523_s17, 4  ;;  %s1624_s18 = int_to_ptr.vmem [resolvable:$true] %s296_s18 }
   0xf   : > { %s280_s21 = sshll.u32 %s1524_s20, 4  ;;  %s1943_s1 = sld [smem:[#allocation16_spill]]  ;;  %s1626_s21 = int_to_ptr.vmem [resolvable:$true] %s280_s21 }
  0x10   : > { %s1941_s16 = scalar_select %p1611_p3, 1, 0 }
  0x11   : > { %p1226_p5 = pneg %p1611_p3 }
  0x13   : > { %p1620_p6 = pnand %p1226_p5, %p1936_p1 }
  0x15   : > { %s1304_s24 = scalar_lea.hbm %s1943_s1, 512  ;;  %p1636_p8 = pneg %p1620_p6 }
  0x16   : > { %p1305_p7 = scmp.ne.s32.totalorder %s1943_s1, %s1304_s24  ;;  %p1311_p11 = scmp.lt.u32.totalorder %s1304_s24, %s1943_s1 }
  0x18   : > { %p1307_p9 = pnand %p1636_p8, %p1305_p7 }
  0x1a   : > { %p1308_p10 = pneg %p1307_p9 }
  0x1c   : > { %p1313_p12 = pnand %p1311_p11, %p1308_p10 }
  0x1e   : > { %1316 = shalt.err (!%p1313_p12)
}
  0x1f   : > { %s1317_s13 = scalar_lea.vmem %s1609_s14, 512  ;;  %p1325_p5 = scmp.lt.s32.totalorder %s1609_s14, %s1609_s14 }
  0x20   : > { %p1318_p13 = scmp.ne.s32.totalorder %s1609_s14, %s1317_s13  ;;  %p1326_p4 = scmp.lt.s32.totalorder %s1317_s13, %s1317_s13 }
  0x22   : > { %p1320_p0 = pnand %p1318_p13, %p1636_p8  ;;  %p1327_p7 = por %p1326_p4, %p1325_p5 }
  0x24   : > { %p1321_p2 = pneg %p1320_p0 }
  0x26   : > { %p1328_p9 = pnand %p1327_p7, %p1321_p2 }
  0x28   : > { %1331 = shalt.err (!%p1328_p9)
}
  0x29   : > { %s1525_s17 = smov 128   ;;  %s1526_s20 = smov 8  }
  0x2a   : > { %1229 = dma.hbm_to_vmem [thread:$0]  (!%p1620_p6), %s1943_s1, 512, %s1609_s14, [#allocation6], %s1525_s17, %s1525_s17, %s1526_s20  }
  0x2b   : > { %s1332_s26 = scalar_lea.hbm %s1930_s5, 2048 }
  0x2c   : > { %p1333_p4 = scmp.ne.s32.totalorder %s1930_s5, %s1332_s26  ;;  %p1339_p12 = scmp.lt.u32.totalorder %s1332_s26, %s1930_s5 }
  0x2e   : > { %p1335_p10 = pnand %p1333_p4, %p1636_p8 }
  0x30   : > { %p1336_p11 = pneg %p1335_p10 }
  0x32   : > { %p1341_p13 = pnand %p1339_p12, %p1336_p11 }
  0x34   : > { %1344 = shalt.err (!%p1341_p13)
}
  0x35   : > { %s1345_s14 = scalar_lea.vmem %s1624_s18, 2048  ;;  %p1353_p7 = scmp.lt.s32.totalorder %s1624_s18, %s1624_s18 }
  0x36   : > { %p1346_p0 = scmp.ne.s32.totalorder %s1624_s18, %s1345_s14  ;;  %p1354_p9 = scmp.lt.s32.totalorder %s1345_s14, %s1345_s14 }
  0x38   : > { %p1348_p2 = pnand %p1346_p0, %p1636_p8  ;;  %p1355_p4 = por %p1354_p9, %p1353_p7 }
  0x3a   : > { %p1349_p5 = pneg %p1348_p2 }
  0x3c   : > { %p1356_p10 = pnand %p1355_p4, %p1349_p5 }
  0x3e   : > { %1359 = shalt.err (!%p1356_p10)
}
  0x3f   : > { %1235 = dma.hbm_to_vmem [thread:$0]  (!%p1620_p6), %s1930_s5, 2048, %s1624_s18, [#allocation9], %s1525_s17, %s1525_s17, %s1526_s20  }
  0x40   : > { %s1360_s25 = scalar_lea.hbm %s1928_s3, 2048 }
  0x41   : > { %p1361_p11 = scmp.ne.s32.totalorder %s1928_s3, %s1360_s25  ;;  %p1367_p0 = scmp.lt.u32.totalorder %s1360_s25, %s1928_s3 }
  0x43   : > { %p1363_p12 = pnand %p1361_p11, %p1636_p8 }
  0x45   : > { %p1364_p13 = pneg %p1363_p12 }
  0x47   : > { %p1369_p2 = pnand %p1367_p0, %p1364_p13 }
  0x49   : > { %1372 = shalt.err (!%p1369_p2)
}
  0x4a   : > { %s1373_s18 = scalar_lea.vmem %s1626_s21, 2048  ;;  %p1381_p4 = scmp.lt.s32.totalorder %s1626_s21, %s1626_s21 }
  0x4b   : > { %p1374_p5 = scmp.ne.s32.totalorder %s1626_s21, %s1373_s18  ;;  %p1382_p10 = scmp.lt.s32.totalorder %s1373_s18, %s1373_s18 }
  0x4d   : > { %p1376_p7 = pnand %p1374_p5, %p1636_p8  ;;  %p1383_p11 = por %p1382_p10, %p1381_p4 }
  0x4f   : > { %p1377_p9 = pneg %p1376_p7 }
  0x51   : > { %p1384_p12 = pnand %p1383_p11, %p1377_p9 }
  0x53   : > { %1387 = shalt.err (!%p1384_p12)
}
  0x54   : > { %1232 = dma.hbm_to_vmem [thread:$0]  (!%p1620_p6), %s1928_s3, 2048, %s1626_s21, [#allocation6], %s1525_s17, %s1525_s17, %s1526_s20  }
  0x55   : > { %s1527_s22 = smov [#allocation10]   ;;  %s1388_s26 = scalar_lea.hbm %s1932_s7, 2048 }
  0x56   : > { %s312_s23 = sshll.u32 %s1527_s22, 4  ;;  %p1389_p13 = scmp.ne.s32.totalorder %s1932_s7, %s1388_s26  ;;  %s313_s23 = int_to_ptr.vmem [resolvable:$true] %s312_s23 }
  0x57   : > { %p1395_p5 = scmp.lt.u32.totalorder %s1388_s26, %s1932_s7 }
  0x58   : > { %p1391_p0 = pnand %p1389_p13, %p1636_p8 }
  0x5a   : > { %p1392_p2 = pneg %p1391_p0 }
  0x5c   : > { %p1397_p7 = pnand %p1395_p5, %p1392_p2 }
  0x5e   : > { %1400 = shalt.err (!%p1397_p7)
}
  0x5f   : > { %s1401_s21 = scalar_lea.vmem %s313_s23, 2048  ;;  %p1409_p11 = scmp.lt.s32.totalorder %s313_s23, %s313_s23 }
  0x60   : > { %p1402_p9 = scmp.ne.s32.totalorder %s313_s23, %s1401_s21  ;;  %p1410_p12 = scmp.lt.s32.totalorder %s1401_s21, %s1401_s21 }
  0x62   : > { %p1404_p4 = pnand %p1402_p9, %p1636_p8  ;;  %p1411_p1 = por %p1410_p12, %p1409_p11 }
  0x64   : > { %p1405_p10 = pneg %p1404_p4 }
  0x66   : > { %p1412_p3 = pnand %p1411_p1, %p1405_p10 }
  0x68   : > { %1415 = shalt.err (!%p1412_p3)
}
  0x69   : > { %1238 = dma.hbm_to_vmem [thread:$0]  (!%p1620_p6), %s1932_s7, 2048, %s313_s23, [#allocation9], %s1525_s17, %s1525_s17, %s1526_s20  }
  0x6a   : > { %s931_s19 = sadd.s32 4294967294, %s1520_s12   ;;  %s1735_s27 = sadd.s32 1, %s1520_s12  }
  0x6b   : > { %s31_s22 = ssub.s32 %s1520_s12, %s1735_s27  ;;  %s34_s24 = sadd.s32 1, %s1516_s11 }
  0x6c   : > { %p32_p1 = scmp.eq.s32.totalorder %s31_s22, 0  ;;  %p41_p3 = scmp.ne.s32.totalorder %s1516_s11, %s1512_s10 }
  0x6d   : > { %p42_p8 = scmp.eq.s32.totalorder %s1520_s12, 0  ;;  %p47_p13 = scmp.ne.s32.totalorder %s1512_s10, %s1508_s30 }
  0x6e   : > { %s1746_s25 = scalar_select %p32_p1, %s1516_s11, %s34_s24  }
  0x6f   : > { %p1748_p0 = por %p42_p8, %p41_p3  ;;  %p1946_p2 = scmp.eq.s32.totalorder %s1604_s15, 0 }
  0x70   : > { %p239_p5 = scmp.eq.s32.totalorder %s1604_s15, 1  ;;  %p245_p7 = scmp.eq.s32.totalorder %s931_s19, 1 }
  0x71   : > { %p1754_p6 = por %p1946_p2, %p47_p13  ;;  %p1251_p9 = scmp.lt.s32.totalorder %s1520_s12, 2 }
  0x72   : > { %s329_s20 = sand.u32 1, %s1516_s11   ;;  %p1761_p4 = por %p239_p5, %p41_p3 }
  0x73   : > { %p1765_p10 = por %p245_p7, %p47_p13  ;;  %s938_s29 = sshll.u32 %s329_s20, 3 }
  0x74   : > { %s1948_s23 = scalar_select %p1761_p4, 1, 0 }
  0x75   : > { %s1949_s28 = scalar_select %p1765_p10, 1, 0 }
  0x76   : > { %s939_s13 = sshll.u32 %s1520_s12, 7  ;;  %s333_s9 = scalar_lea.vmem [#allocation2], %s938_s29 }
  0x77   : > { %s1773_s14 = scalar_lea.hbm %s1925_s0, %s939_s13  ;;  %s340_s19 = sshll.u32 %s333_s9, 4  ;;  %s1775_s19 = int_to_ptr.vmem [resolvable:$true] %s340_s19 }
  0x78   : > { %p1779_p11 = pnand %p1251_p9, %p1748_p0  ;;  %s330_s24 = scalar_lea.sflag [#allocation3], %s329_s20 }
  0x79   : > { %s1416_s1 = scalar_lea.hbm %s1773_s14, 128  ;;  %s1421_s18 = scalar_lea.hbm %s1925_s0, 256 }
  0x7a   : > { %p1417_p12 = scmp.ne.s32.totalorder %s1773_s14, %s1416_s1  ;;  %p1418_p1 = pneg %p1779_p11 }
  0x7b   : > { %p1422_p13 = scmp.lt.u32.totalorder %s1773_s14, %s1925_s0  ;;  %p1423_p0 = scmp.lt.u32.totalorder %s1421_s18, %s1416_s1 }
  0x7c   : > { %p1419_p3 = pnand %p1418_p1, %p1417_p12  ;;  %p1425_p5 = scmp.lt.u32.totalorder %s1416_s1, %s1773_s14 }
  0x7d   : > { %p1424_p2 = por %p1423_p0, %p1422_p13 }
  0x7e   : > { %p1420_p8 = pneg %p1419_p3 }
  0x7f   : > { %p1426_p7 = por %p1425_p5, %p1424_p2 }
  0x81   : > { %p1427_p9 = pnand %p1426_p7, %p1420_p8 }
  0x83   : > { %1430 = shalt.err (!%p1427_p9)
}
  0x84   : > { %s1431_s20 = scalar_lea.vmem %s1775_s19, 128  ;;  %s1528_s9 = smov [#allocation2]  }
  0x85   : > { %p1432_p12 = scmp.ne.s32.totalorder %s1775_s19, %s1431_s20  ;;  %s1436_s29 = sshll.u32 %s1528_s9, 4  ;;  %s1437_s29 = int_to_ptr.vmem [resolvable:$false] %s1436_s29 }
  0x86   : > { %s1438_s13 = scalar_lea.vmem %s1437_s29, 256  ;;  %p1439_p4 = scmp.lt.s32.totalorder %s1775_s19, %s1437_s29 }
  0x87   : > { %p1434_p3 = pnand %p1432_p12, %p1418_p1  ;;  %p1440_p13 = scmp.lt.s32.totalorder %s1438_s13, %s1431_s20 }
  0x89   : > { %p1435_p10 = pneg %p1434_p3  ;;  %p1441_p0 = por %p1440_p13, %p1439_p4 }
  0x8b   : > { %p1442_p2 = pnand %p1441_p0, %p1435_p10 }
  0x8d   : > { %1445 = shalt.err (!%p1442_p2)
}
  0x8e   : > { %1242 = dma.hbm_to_vmem [thread:$0]  (!%p1779_p11), %s1773_s14, 128, %s1775_s19, %s330_s24  }
  0x8f   : > { %p1951_p8 = scmp.ne.s32.totalorder %s1941_s16, 0 }
  0x90   : > { %s1811_s1 = sand.u32 (!%p1951_p8), 1, %s1512_s10  }
  0x91   : > { %349 = sbr.rel (%p1951_p8) target bundleno = 1966 (0x7ae), region = 56  ;;  %s941_s18 = sshll.u32 (!%p1951_p8), %s1811_s1, 3 }
  0x92   : > { %s352_s26 = scalar_lea.sflag (!%p1951_p8), [#allocation3], %s1811_s1  ;;  %s355_s21 = scalar_lea.vmem (!%p1951_p8), [#allocation2], %s941_s18 }
  0x98   : > { %1491 = dma.done.wait (%p1754_p6), %s352_s26, 128  }
  0x99   : > { %1493 = vsyncadd (%p1754_p6), %s352_s26, 4294967168  ;;  %p1952_p4 = scmp.eq.s32.totalorder %s1604_s15, 0 }
  0x9b   : > { %1495 = dma.done.wait (%p1952_p4), [#allocation6], 2560   ;;  %p1953_p10 = pmov %p1952_p4 }
  0x9c   : > { %p1954_p11 = pmov %p1952_p4 }
  0x9d   : > { %1497 = vsyncadd (%p1953_p10), [#allocation6], 4294964736 }
  0x9e   : > { %1499 = dma.done.wait (%p1954_p11), [#allocation9], 4096   ;;  %p1955_p1 = pmov %p1952_p4 }
  0x9f   : > { %v1529_v0 = vmov 0.0|0.0   ;;  %vm1530_vm0 = vmmov 0   ;;  %v1531_v1 = vmov 0.0   ;;  %v407_v2 = vld [vmem:[#allocation5] sm:$0xff]  ;;  %v408_v3 = vld [vmem:[#allocation5 + $0x8] sm:$0xff]  ;;  %v409_v4 = vld [vmem:[#allocation5 + $0x10] sm:$0xff] }
  0xa0   : > { %1501 = vsyncadd (%p1955_p1), [#allocation9], 4294963200  ;;  %1128 = vmatprep.subr.bf16.mxu0 %v1529_v0  ;;  %1020 = vmatprep.mubr.msk.f32.mxu0 %vm1530_vm0, %v1531_v1  ;;  %v1129_v5 = vpack.c.bf16 %v408_v3, %v407_v2  ;;  %v410_v6 = vld [vmem:[#allocation5 + $0x18] sm:$0xff]  ;;  %vm418_vm1 = vcmask 261120   ;;  %v947_v9 = vld [vmem:[%s1927_s2] ss:$0 sm:$0xff] }
  0xa1   : > { %1134 = vmatprep.subr.bf16.mxu1 %v1529_v0  ;;  %1055 = vmatprep.mubr.msk.f32.mxu1 %vm1530_vm0, %v1531_v1  ;;  %v1132_v7 = vpack.c.bf16 %v410_v6, %v409_v4  ;;  %v406_v8 = vld [vmem:[%s355_s21] sm:$0xff]  ;;  %v505_v13 = vld [vmem:[#allocation7] sm:$0xff]  ;;  %v506_v14 = vld [vmem:[#allocation7 + $0x8] sm:$0xff]  ;;  %s953_s29 = sshll.u32 %s1604_s15, 7  ;;  %s405_s13 = scalar_lea.vmem [#allocation11], %s941_s18 }
  0xa2   : > { %1130 = vmatpush3.bf16.msra.mxu0 %v1129_v5  ;;  %v507_v15 = vld [vmem:[#allocation7 + $0x10] sm:$0xff]  ;;  %v1135_v16 = vpack.c.bf16 %v506_v14, %v505_v13  ;;  %v508_v17 = vld [vmem:[#allocation7 + $0x18] sm:$0xff]  ;;  %v509_v19 = vld [vmem:[#allocation7 + $0x20] sm:$0xff]  ;;  %s823_s26 = sshll.u32 %s405_s13, 4  ;;  %s1956_s17 = sld [smem:[#allocation17_spill]]  ;;  %s1883_s26 = int_to_ptr.vmem [resolvable:$true] %s823_s26 }
  0xa3   : > { %1131 = vmatprep.subr.bf16.mxu0 %v1529_v0  ;;  %v1138_v18 = vpack.c.bf16 %v508_v17, %v507_v15  ;;  %v510_v20 = vld [vmem:[#allocation7 + $0x28] sm:$0xff]  ;;  %v511_v26 = vld [vmem:[#allocation7 + $0x30] sm:$0xff]  ;;  %v512_v27 = vld [vmem:[#allocation7 + $0x38] sm:$0xff]  ;;  %s810_s19 = scalar_lea.sflag [#allocation4], %s1811_s1  ;;  %s1446_s22 = scalar_lea.vmem %s1883_s26, 128 }
  0xa4   : > { %1136 = vmatpush3.bf16.msra.mxu1 %v1135_v16  ;;  %v1141_v21 = vpack.c.bf16 %v510_v20, %v509_v19  ;;  %v1144_v28 = vpack.c.bf16 %v512_v27, %v511_v26  ;;  %v513_v29 = vld [vmem:[#allocation7 + $0x40] sm:$0xff]  ;;  %v514_v30 = vld [vmem:[#allocation7 + $0x48] sm:$0xff]  ;;  %v515_v32 = vld [vmem:[#allocation7 + $0x50] sm:$0xff]  ;;  %p1447_p6 = scmp.ne.s32.totalorder %s1883_s26, %s1446_s22  ;;  %p1957_p5 = scmp.ne.s32.totalorder %s1948_s23, 0 }
  0xa5   : > { %1137 = vmatprep.subr.bf16.mxu1 %v1529_v0  ;;  %v1147_v31 = vpack.c.bf16 %v514_v30, %v513_v29  ;;  %v516_v33 = vld [vmem:[#allocation7 + $0x58] sm:$0xff]  ;;  %v517_v35 = vld [vmem:[#allocation7 + $0x60] sm:$0xff]  ;;  %v518_v36 = vld [vmem:[#allocation7 + $0x68] sm:$0xff]  ;;  %s1532_s15 = smov [#allocation11]  }
  0xa6   : > { %1133 = vmatpush3.bf16.msra.mxu0 %v1132_v7  ;;  %v1150_v34 = vpack.c.bf16 %v516_v33, %v515_v32  ;;  %v1153_v37 = vpack.c.bf16 %v518_v36, %v517_v35  ;;  %v519_v38 = vld [vmem:[#allocation7 + $0x70] sm:$0xff]  ;;  %v520_v39 = vld [vmem:[#allocation7 + $0x78] sm:$0xff]  ;;  %v610_v51 = vld [vmem:[#allocation8] sm:$0xff]  ;;  %p1448_p7 = pnand %p1447_p6, %p1957_p5  ;;  %s1450_s18 = sshll.u32 %s1532_s15, 4  ;;  %s1451_s18 = int_to_ptr.vmem [resolvable:$false] %s1450_s18 }
  0xa7   : > { %1158 = vmatprep.subr.bf16.mxu0 %v1529_v0  ;;  %v1156_v40 = vpack.c.bf16 %v520_v39, %v519_v38  ;;  %v949_v47 = vld [vmem:[%s1929_s4] ss:$0 sm:$0xff]  ;;  %v611_v52 = vld [vmem:[#allocation8 + $0x8] sm:$0xff]  ;;  %v613_v55 = vld [vmem:[#allocation8 + $0x18] sm:$0xff]  ;;  %s1452_s24 = scalar_lea.vmem %s1451_s18, 256  ;;  %p1453_p12 = scmp.lt.s32.totalorder %s1883_s26, %s1451_s18 }
  0xa8   : > { %1139 = vmatpush3.bf16.msra.mxu1 %v1138_v18  ;;  %v612_v53 = vld [vmem:[#allocation8 + $0x10] sm:$0xff]  ;;  %v1159_v54 = vpack.c.bf16 %v611_v52, %v610_v51  ;;  %v614_v57 = vld [vmem:[#allocation8 + $0x20] sm:$0xff]  ;;  %v615_v58 = vld [vmem:[#allocation8 + $0x28] sm:$0xff]  ;;  %s1881_s14 = scalar_lea.hbm %s1956_s17, %s953_s29  ;;  %p1449_p9 = pneg %p1448_p7 }
  0xa9   : > { %1021 = vmatmul.mubr.msk.f32.vlgmr.msra.gmra.mrb[0].mxu0 %vm418_vm1, %v406_v8  ;;  %1140 = vmatprep.subr.bf16.mxu1 %v1529_v0  ;;  %v1162_v56 = vpack.c.bf16 %v613_v55, %v612_v53  ;;  %v1165_v59 = vpack.c.bf16 %v615_v58, %v614_v57  ;;  %v617_v2 = vld [vmem:[#allocation8 + $0x38] sm:$0xff]  ;;  %v618_v4 = vld [vmem:[#allocation8 + $0x40] sm:$0xff]  ;;  %v619_v5 = vld [vmem:[#allocation8 + $0x48] sm:$0xff]  ;;  %p1454_p3 = scmp.lt.s32.totalorder %s1452_s24, %s1446_s22 }
  0xaa   : > { %1090 = vmatprep.mubr.msk.f32.mxu0 %vm1530_vm0, %v1531_v1  ;;  %1160 = vmatpush3.bf16.msra.mxu0 %v1159_v54  ;;  %v1171_v6 = vpack.c.bf16 %v619_v5, %v618_v4  ;;  %v620_v7 = vld [vmem:[#allocation8 + $0x50] sm:$0xff]  ;;  %v621_v8 = vld [vmem:[#allocation8 + $0x58] sm:$0xff]  ;;  %v715_v26 = vld [vmem:[#allocation10] sm:$0xff] }
  0xab   : > { %1161 = vmatprep.subr.bf16.mxu0 %v1529_v0  ;;  %v624_v13 = vld [vmem:[#allocation8 + $0x70] sm:$0xff]  ;;  %v625_v14 = vld [vmem:[#allocation8 + $0x78] sm:$0xff]  ;;  %v716_v27 = vld [vmem:[#allocation10 + $0x8] sm:$0xff]  ;;  %p1455_p13 = por %p1454_p3, %p1453_p12 }
  0xac   : > { %1142 = vmatpush3.bf16.msra.mxu1 %v1141_v21  ;;  %v1180_v15 = vpack.c.bf16 %v625_v14, %v624_v13  ;;  %v1183_v29 = vpack.c.bf16 %v716_v27, %v715_v26  ;;  %v718_v30 = vld [vmem:[#allocation10 + $0x18] sm:$0xff]  ;;  %v719_v32 = vld [vmem:[#allocation10 + $0x20] sm:$0xff]  ;;  %v720_v33 = vld [vmem:[#allocation10 + $0x28] sm:$0xff] }
  0xad   : > { %1143 = vmatprep.subr.bf16.mxu1 %v1529_v0  ;;  %v721_v39 = vld [vmem:[#allocation10 + $0x30] sm:$0xff]  ;;  %v730_v52 = vld [vmem:[#allocation10 + $0x78] sm:$0xff]  ;;  %p1456_p0 = pnand %p1455_p13, %p1449_p9 }
  0xae   : > { %1163 = vmatpush3.bf16.msra.mxu0 %v1162_v56  ;;  %v729_v51 = vld [vmem:[#allocation10 + $0x70] sm:$0xff] }
  0xaf   : > { %1164 = vmatprep.subr.bf16.mxu0 %v1529_v0  ;;  %v1204_v53 = vpack.c.bf16 %v730_v52, %v729_v51 }
  0xb0   : > { %1145 = vmatpush3.bf16.msra.mxu1 %v1144_v28  ;;  %v717_v28 = vld [vmem:[#allocation10 + $0x10] sm:$0xff] }
  0xb1   : > { %1146 = vmatprep.subr.bf16.mxu1 %v1529_v0 }
  0xb2   : > { %1166 = vmatpush3.bf16.msra.mxu0 %v1165_v59 }
  0xb3   : > { %1167 = vmatprep.subr.bf16.mxu0 %v1529_v0 }
  0xb4   : > { %1148 = vmatpush3.bf16.msra.mxu1 %v1147_v31  ;;  %v1186_v31 = vpack.c.bf16 %v718_v30, %v717_v28 }
  0xb5   : > { %1149 = vmatprep.subr.bf16.mxu1 %v1529_v0 }
  0xb8   : > { %1151 = vmatpush3.bf16.msra.mxu1 %v1150_v34  ;;  %v1189_v34 = vpack.c.bf16 %v720_v33, %v719_v32 }
  0xb9   : > { %1152 = vmatprep.subr.bf16.mxu1 %v1529_v0 }
  0xbc   : > { %1154 = vmatpush3.bf16.msra.mxu1 %v1153_v37 }
  0xbd   : > { %1155 = vmatprep.subr.bf16.mxu1 %v1529_v0 }
  0xc0   : > { %1157 = vmatpush3.bf16.msra.mxu1 %v1156_v40  ;;  %v722_v40 = vld [vmem:[#allocation10 + $0x38] sm:$0xff] }
  0xc1   : > { %1182 = vmatprep.subr.bf16.mxu1 %v1529_v0 }
 0x17c   : > { %v488_v10 = vpop.f32.mrb[0].mxu0 }
 0x17d   : > { %v489_v11 = vadd.f32 %v947_v9, %v488_v10  ;;  %v1022_v12 = vpop.f32.mrb[1].mxu0  ;;  %v1174_v9 = vpack.c.bf16 %v621_v8, %v620_v7  ;;  %v622_v10 = vld [vmem:[#allocation8 + $0x60] sm:$0xff] }
 0x17f   : > { %492 = vadd.xlane.f32.xlu0 %v489_v11 }
 0x20c   : > { %v493_v22 = vpop.xlane.xlu0 %492 }
 0x20d   : > { %v495_v23 = vmul.f32 0.0078125, %v493_v22  ;;  %v950_v22 = vld [vmem:[%s1931_s6] ss:$0 sm:$0xff] }
 0x20f   : > { %v496_v24 = vsub.f32 %v489_v11, %v495_v23  ;;  %v623_v11 = vld [vmem:[#allocation8 + $0x68] sm:$0xff] }
 0x210   : > { %v1177_v12 = vpack.c.bf16 %v623_v11, %v622_v10 }
 0x211   : > { %v497_v25 = vmul.f32 %v496_v24, %v496_v24 }
 0x213   : > { %498 = vadd.xlane.f32.xlu0 %v497_v25 }
 0x2a0   : > { %v499_v41 = vpop.xlane.xlu0 %498 }
 0x2a1   : > { %v500_v42 = vmul.f32 0.0078125, %v499_v41  ;;  %v1192_v41 = vpack.c.bf16 %v722_v40, %v721_v39 }
 0x2a3   : > { %v501_v43 = vadd.f32 1e-05, %v500_v42  ;;  %v723_v42 = vld [vmem:[#allocation10 + $0x40] sm:$0xff] }
 0x2a5   : > { %1298 = vrsqrt.f32 %v501_v43  ;;  %v724_v43 = vld [vmem:[#allocation10 + $0x48] sm:$0xff] }
 0x2af   : > { %v1299_v44 = vpop.eup %1298 }
 0x2b0   : > { %v503_v45 = vmul.f32 %v1299_v44, %v496_v24  ;;  %v1195_v44 = vpack.c.bf16 %v724_v43, %v723_v42 }
 0x2b2   : > { %v504_v46 = vmax.f32 %v503_v45, 0.0  ;;  %v725_v45 = vld [vmem:[#allocation10 + $0x50] sm:$0xff] }
 0x2b4   : > { %1056 = vmatmul.mubr.f32.vlgmr.msra.gmra.mrb[0].mxu1 %v504_v46  ;;  %v726_v46 = vld [vmem:[#allocation10 + $0x58] sm:$0xff] }
 0x2b5   : > { %1125 = vmatprep.mubr.msk.f32.mxu1 %vm1530_vm0, %v1531_v1  ;;  %v616_v1 = vld [vmem:[#allocation8 + $0x30] sm:$0xff]  ;;  %1184 = vmatpush3.bf16.msra.mxu1 %v1183_v29 }
 0x2b6   : > { %v1168_v3 = vpack.c.bf16 %v617_v2, %v616_v1  ;;  %1185 = vmatprep.subr.bf16.mxu1 %v1529_v0 }
 0x2b8   : > { %1169 = vmatpush3.bf16.msra.mxu0 %v1168_v3 }
 0x2b9   : > { %1170 = vmatprep.subr.bf16.mxu0 %v1529_v0  ;;  %1187 = vmatpush3.bf16.msra.mxu1 %v1186_v31 }
 0x2ba   : > { %1188 = vmatprep.subr.bf16.mxu1 %v1529_v0 }
 0x2bc   : > { %1172 = vmatpush3.bf16.msra.mxu0 %v1171_v6 }
 0x2bd   : > { %1173 = vmatprep.subr.bf16.mxu0 %v1529_v0  ;;  %1190 = vmatpush3.bf16.msra.mxu1 %v1189_v34 }
 0x2be   : > { %1191 = vmatprep.subr.bf16.mxu1 %v1529_v0 }
 0x2c0   : > { %1175 = vmatpush3.bf16.msra.mxu0 %v1174_v9 }
 0x2c1   : > { %1176 = vmatprep.subr.bf16.mxu0 %v1529_v0  ;;  %1193 = vmatpush3.bf16.msra.mxu1 %v1192_v41 }
 0x2c2   : > { %1194 = vmatprep.subr.bf16.mxu1 %v1529_v0 }
 0x2c4   : > { %1178 = vmatpush3.bf16.msra.mxu0 %v1177_v12 }
 0x2c5   : > { %1179 = vmatprep.subr.bf16.mxu0 %v1529_v0  ;;  %1196 = vmatpush3.bf16.msra.mxu1 %v1195_v44 }
 0x2c6   : > { %1197 = vmatprep.subr.bf16.mxu1 %v1529_v0 }
 0x2c8   : > { %1181 = vmatpush3.bf16.msra.mxu0 %v1180_v15 }
 0x387   : > { %v594_v48 = vpop.f32.mrb[0].mxu1 }
 0x388   : > { %v595_v49 = vadd.f32 %v949_v47, %v594_v48  ;;  %v1057_v50 = vpop.f32.mrb[1].mxu1  ;;  %v1198_v47 = vpack.c.bf16 %v726_v46, %v725_v45  ;;  %v727_v48 = vld [vmem:[#allocation10 + $0x60] sm:$0xff] }
 0x38a   : > { %598 = vadd.xlane.f32.xlu1 %v595_v49  ;;  %1199 = vmatpush3.bf16.msra.mxu1 %v1198_v47 }
 0x38b   : > { %1200 = vmatprep.subr.bf16.mxu1 %v1529_v0 }
 0x417   : > { %v599_v60 = vpop.xlane.xlu1 %598 }
 0x418   : > { %v600_v61 = vmul.f32 0.0078125, %v599_v60  ;;  %v951_v60 = vld [vmem:[%s1933_s8] ss:$0 sm:$0xff] }
 0x41a   : > { %v601_v62 = vsub.f32 %v595_v49, %v600_v61  ;;  %v728_v49 = vld [vmem:[#allocation10 + $0x68] sm:$0xff] }
 0x41b   : > { %v1201_v50 = vpack.c.bf16 %v728_v49, %v727_v48 }
 0x41c   : > { %v602_v63 = vmul.f32 %v601_v62, %v601_v62 }
 0x41d   : > { %1202 = vmatpush3.bf16.msra.mxu1 %v1201_v50 }
 0x41e   : > { %603 = vadd.xlane.f32.xlu1 %v602_v63  ;;  %1203 = vmatprep.subr.bf16.mxu1 %v1529_v0 }
 0x421   : > { %1205 = vmatpush3.bf16.msra.mxu1 %v1204_v53 }
 0x4ab   : > { %v604_v16 = vpop.xlane.xlu1 %603 }
 0x4ac   : > { %v605_v17 = vmul.f32 0.0078125, %v604_v16 }
 0x4ae   : > { %v606_v18 = vadd.f32 1e-05, %v605_v17 }
 0x4b0   : > { %1300 = vrsqrt.f32 %v606_v18 }
 0x4ba   : > { %v1301_v19 = vpop.eup %1300 }
 0x4bb   : > { %v608_v20 = vmul.f32 %v1301_v19, %v601_v62 }
 0x4bd   : > { %v609_v21 = vmax.f32 %v608_v20, 0.0 }
 0x4bf   : > { %1091 = vmatmul.mubr.f32.vlgmr.msra.gmra.mrb[2].mxu0 %v609_v21 }
 0x592   : > { %v699_v23 = vpop.f32.mrb[2].mxu0 }
 0x593   : > { %v700_v24 = vadd.f32 %v950_v22, %v699_v23  ;;  %v1092_v25 = vpop.f32.mrb[3].mxu0 }
 0x595   : > { %703 = vadd.xlane.f32.xlu0 %v700_v24 }
 0x622   : > { %v704_v35 = vpop.xlane.xlu0 %703 }
 0x623   : > { %v705_v36 = vmul.f32 0.0078125, %v704_v35 }
 0x625   : > { %v706_v37 = vsub.f32 %v700_v24, %v705_v36 }
 0x627   : > { %v707_v38 = vmul.f32 %v706_v37, %v706_v37 }
 0x629   : > { %708 = vadd.xlane.f32.xlu1 %v707_v38 }
 0x6b6   : > { %v709_v54 = vpop.xlane.xlu1 %708 }
 0x6b7   : > { %v710_v55 = vmul.f32 0.0078125, %v709_v54 }
 0x6b9   : > { %v711_v56 = vadd.f32 1e-05, %v710_v55 }
 0x6bb   : > { %1302 = vrsqrt.f32 %v711_v56 }
 0x6c5   : > { %v1303_v57 = vpop.eup %1302 }
 0x6c6   : > { %v713_v58 = vmul.f32 %v1303_v57, %v706_v37 }
 0x6c8   : > { %v714_v59 = vmax.f32 %v713_v58, 0.0 }
 0x6ca   : > { %1126 = vmatmul.mubr.f32.vlgmr.msra.gmra.mrb[2].mxu1 %v714_v59 }
 0x79d   : > { %v804_v0 = vpop.f32.mrb[2].mxu1 }
 0x79e   : > { %v805_v61 = vadd.f32 %v951_v60, %v804_v0  ;;  %v1127_v62 = vpop.f32.mrb[3].mxu1 }
 0x7a0   : > { %808 = vst [vmem:[%s405_s13] sm:$0xff] %v805_v61 }
 0x7a1   : > { %1459 = shalt.err (!%p1456_p0)
}
 0x7a2   : > { %s1460_s1 = scalar_lea.hbm %s1881_s14, 128  ;;  %s1464_s29 = scalar_lea.hbm %s1956_s17, 256 }
 0x7a3   : > { %p1461_p2 = scmp.ne.s32.totalorder %s1881_s14, %s1460_s1  ;;  %p1465_p10 = scmp.lt.u32.totalorder %s1881_s14, %s1956_s17 }
 0x7a4   : > { %p1466_p11 = scmp.lt.u32.totalorder %s1464_s29, %s1460_s1  ;;  %p1468_p6 = scmp.lt.u32.totalorder %s1460_s1, %s1881_s14 }
 0x7a5   : > { %p1462_p8 = pnand %p1461_p2, %p1957_p5 }
 0x7a6   : > { %p1467_p1 = por %p1466_p11, %p1465_p10 }
 0x7a7   : > { %p1463_p4 = pneg %p1462_p8 }
 0x7a8   : > { %p1469_p7 = por %p1468_p6, %p1467_p1 }
 0x7aa   : > { %p1470_p9 = pnand %p1469_p7, %p1463_p4 }
 0x7ac   : > { %1473 = shalt.err (!%p1470_p9)
}
 0x7ad   : > { %1224 = dma.vmem_to_hbm [thread:$0]  (%p1957_p5), %s1883_s26, 128, %s1881_s14, %s810_s19  }
 0x7ae PF: > { %s835_s16 = sand.u32 1, %s1508_s30   ;;  %p1958_p12 = scmp.ne.s32.totalorder %s1949_s28, 0 }
 0x7af   : > { %p1959_p3 = scmp.ge.s32.totalorder %s1520_s12, 2  ;;  %s836_s22 = scalar_lea.sflag [#allocation4], %s835_s16 }
 0x7b1   : > { %p1244_p13 = pnand %p1959_p3, %p1958_p12 }
 0x7b3   : > { %1503 = dma.done.wait (!%p1244_p13), %s836_s22, 128  }
 0x7b4   : > { %1505 = vsyncadd (!%p1244_p13), %s836_s22, 4294967168  ;;  %p24_p0 = scmp.ge.s32.totalorder %s1735_s27, 4   ;;  %s1960_s30 = smov %s1512_s10 }
 0x7b5   : > { %s1961_s10 = smov %s1516_s11  ;;  %s1962_s11 = smov %s1746_s25 }
 0x7b6   : > { %s1963_s12 = smov %s1735_s27  ;;  %26 = sbr.rel (!%p24_p0) target bundleno = 10 (0xa), region = 117 }
 0x7bd   :  { %841 = vsyncpa [#allocation3], 1 }
 0x7be   :  { %843 = vsyncpa [#allocation3 + $0x1], 1 }
 0x7bf   :  { %844 = vsyncpa [#allocation6], 1 }
 0x7c0   :  { %845 = vsyncpa [#allocation9], 1 }
 0x7c1   :  { %846 = vsyncpa [#allocation4], 1 }
 0x7c2   :  { %848 = vsyncpa [#allocation4 + $0x1], 1 }

</bundles_post_ra>
